<compile_context>
chip_gen: v7x
topology: tpu7x:2x2x1
jax: 0.10.0
libtpu: 0.0.40
codegen_flags: <defaults>
</compile_context>

<pallas_src>
import math

import jax
import jax.numpy as jnp
from jax.experimental import pallas as pl
from jax.experimental.pallas import tpu as pltpu


def _flatten_copy_kernel(x_ref, o_ref, sem):
    # x_ref / o_ref are raw HBM refs (memory_space=pl.ANY) with identical
    # (n, flat) shapes: issue one contiguous HBM->HBM DMA and wait for it.
    cp = pltpu.make_async_copy(x_ref, o_ref, sem)
    cp.start()
    cp.wait()


def flatten(x: jax.Array) -> jax.Array:
    """Pallas equivalent of torch Flatten.forward: x.view(x.shape[0], -1)."""
    n = x.shape[0]
    flat = math.prod(x.shape[1:]) if x.ndim > 1 else 1

    # Free, wrapper-level reshape (metadata-only in XLA) so the kernel only
    # performs a shape-preserving copy of a contiguous (n, flat) slab.
    x2 = jnp.reshape(x, (n, flat))

    return pl.pallas_call(
        _flatten_copy_kernel,
        out_shape=jax.ShapeDtypeStruct((n, flat), x.dtype),
        in_specs=[pl.BlockSpec(memory_space=pl.ANY)],
        out_specs=pl.BlockSpec(memory_space=pl.ANY),
        scratch_shapes=[pltpu.SemaphoreType.DMA(())],
    )(x2)


if __name__ == "__main__":
    key = jax.random.PRNGKey(0)
    # Small NCHW input: batch=2, channels=4, spatial=16x16.
    x = jax.random.normal(key, (2, 4, 16, 16), dtype=jnp.float32)

    out = flatten(x)
    out = jax.block_until_ready(out)

    # Reference: plain reshape (same semantics as torch .view(N, -1)).
    ref = jnp.reshape(x, (x.shape[0], -1))
    assert out.shape == (2, 4 * 16 * 16), out.shape
    assert out.dtype == x.dtype, out.dtype
    assert jnp.array_equal(out, ref), "mismatch vs reference reshape"

    print("KERNEL_OK")
</pallas_src>

<mosaic_0001>
module attributes {stable_mosaic.version = 11 : i64} {
  func.func @_flatten_copy_kernel(%arg0: memref<2x1024xf32, #tpu.memory_space<any>>, %arg1: memref<2x1024xf32, #tpu.memory_space<any>>, %arg2: memref<!tpu.dma_semaphore, #tpu.memory_space<semaphore_mem>>) attributes {dimension_semantics = [], scalar_prefetch = 0 : i64, scratch_operands = 1 : i64, tpu.core_type = #tpu.core_type<tc>} {
    tpu.enqueue_dma source(%arg0 : memref<2x1024xf32, #tpu.memory_space<any>>) target(%arg1 : memref<2x1024xf32, #tpu.memory_space<any>>) target_semaphore(%arg2 : memref<!tpu.dma_semaphore, #tpu.memory_space<semaphore_mem>>)
    tpu.wait_dma2 semaphore(%arg2 : memref<!tpu.dma_semaphore, #tpu.memory_space<semaphore_mem>>) src(%arg0 : memref<2x1024xf32, #tpu.memory_space<any>>) dst(%arg1 : memref<2x1024xf32, #tpu.memory_space<any>>)
    return
  }
}

</mosaic_0001>

<bundles_post_ra>
// kernel: tpu_custom_call.1
= control target key start
LH: loop header
LB: loop body
LE: loop exit
PB: predicated region body
PF: predicated region fallthrough
CT: control target
= control target key end

     0   :  { %s35_s6 = smov [#allocation2]   ;;  %s36_s7 = smov [#allocation3]   ;;  %s54_s0 = inlined_call_operand.hbm [shape: f32[2,1024], index: 0, kind: input, shape index: {}]   ;;  %s55_s1 = inlined_call_operand.hbm [shape: f32[2,1024], index: 1, kind: output, shape index: {}]  }
   0x1   :  { %s37_s8 = smov 0  }
   0x2   :  { %18 = dma.general %s54_s0, 256, %s55_s1, %s35_s6, %s36_s7, [#allocation4], %s37_s8, 0  }
   0x3   :  { %33 = dma.done.wait [#allocation2], 256 }
   0x4   :  { %34 = vsyncadd [#allocation2], 4294967040 }
   0x5   :  { %23 = vsyncmov [#allocation2] }
   0x8   :  { %s24_s13 = vpop.sfrf %23 }
   0x9   :  { %p29_p0 = scmp.ne.s32.totalorder %s24_s13, 0 }
   0xb   :  { %28 = shalt.err (%p29_p0)  }

</bundles_post_ra>
